<compile_context>
chip_gen: v5e
topology: v5e:2x2
jax: 0.10.0
libtpu: 0.0.40
codegen_flags: <defaults>
</compile_context>

<pallas_src>
import functools

import jax
import jax.numpy as jnp
from jax.experimental import pallas as pl
from jax.experimental.pallas import tpu as pltpu


def _round_up(x, m):
    return (x + m - 1) // m * m


def _pad_axis(x, target, axis):
    pad = target - x.shape[axis]
    if pad == 0:
        return x
    widths = [(0, 0)] * x.ndim
    widths[axis] = (0, pad)
    return jnp.pad(x, widths)


# ---------------- fused linear (+ optional ReLU) Pallas kernel ----------------
def _linear_act_kernel(x_ref, w_ref, b_ref, o_ref, *, apply_relu):
    """One (tm, tn) output tile; full-K matmul, bias + optional ReLU fused."""
    out = jnp.dot(x_ref[...], w_ref[...], preferred_element_type=jnp.float32)
    out = out + b_ref[...]  # (1, tn) broadcast over rows, f32
    if apply_relu:
        out = jnp.maximum(out, 0.0)
    o_ref[...] = out.astype(o_ref.dtype)


def _pick_tn(Np, max_tn, want_two_tiles):
    """Largest divisor of Np (multiple of 128) <= max_tn; optionally force >=2 tiles."""
    cands = [c for c in range(128, Np + 1, 128) if Np % c == 0]
    cap = max_tn
    if want_two_tiles and Np >= 256:
        cap = min(cap, Np // 2)
    good = [c for c in cands if c <= cap]
    return max(good) if good else min(cands)


def _pick_tiles(M, Kp, Np, out_bytes, vmem_budget=32 * 1024 * 1024):
    """Pick (tm, tn) with tk = Kp, budgeted for v7x's 64 MiB VMEM (double-buffered)."""
    Mp8 = _round_up(max(M, 1), 8)
    tm = min(512, Mp8)
    # If only one M-tile, split along N so a v7x megacore can shard the grid.
    want_two = _round_up(Mp8, tm) // tm < 2
    tn = _pick_tn(Np, max_tn=512, want_two_tiles=want_two)

    def vmem(tm_, tn_):
        # 2x for double buffering: x tile (bf16) + w tile (bf16) + bias + out tile.
        return 2 * (tm_ * Kp * 2 + Kp * tn_ * 2 + tn_ * 4 + tm_ * tn_ * out_bytes)

    while vmem(tm, tn) > vmem_budget and tm > 8:
        tm = max(8, tm // 2)
    while vmem(tm, tn) > vmem_budget and tn > 128:
        tn = _pick_tn(Np, max_tn=tn // 2, want_two_tiles=False)
    return tm, tn


def fused_linear(x2d, w_p, b_p, *, apply_relu, out_dtype):
    """y = act(x2d @ W + b) on pre-padded bf16 weights.

    x2d: (M, K) f32/bf16;  w_p: (Kp, Np) bf16 (pre-padded);  b_p: (1, Np) f32.
    Returns padded (Mp, Np) output; caller slices.
    """
    M, K = x2d.shape
    Kp, Np = w_p.shape

    out_bytes = jnp.dtype(out_dtype).itemsize
    tm, tn = _pick_tiles(M, Kp, Np, out_bytes)
    Mp = _round_up(M, tm)

    # Only the activation is padded/cast per call (cheap; fuses under jit).
    x_p = _pad_axis(_pad_axis(x2d, Mp, 0), Kp, 1).astype(jnp.bfloat16)

    grid = (Mp // tm, Np // tn)
    kernel = functools.partial(_linear_act_kernel, apply_relu=apply_relu)

    out = pl.pallas_call(
        kernel,
        out_shape=jax.ShapeDtypeStruct((Mp, Np), out_dtype),
        grid_spec=pltpu.PrefetchScalarGridSpec(
            num_scalar_prefetch=0,
            grid=grid,
            in_specs=[
                pl.BlockSpec((tm, Kp), lambda i, j: (i, 0)),
                pl.BlockSpec((Kp, tn), lambda i, j: (0, j)),
                pl.BlockSpec((1, tn), lambda i, j: (0, j)),
            ],
            out_specs=pl.BlockSpec((tm, tn), lambda i, j: (i, j)),
        ),
        compiler_params=pltpu.CompilerParams(
            dimension_semantics=("parallel", "parallel"),
            vmem_limit_bytes=48 * 1024 * 1024,
        ),
    )(x_p, w_p, b_p)
    return out


@functools.partial(jax.jit, static_argnames=("out_dim", "apply_relu", "out_dtype"))
def _linear_encode(image, w_p, b_p, *, out_dim, apply_relu, out_dtype):
    """Jitted end-to-end forward: flatten -> fused linear(+relu) -> unflatten."""
    feat = image.reshape(-1, image.shape[-1])
    out = fused_linear(feat, w_p, b_p, apply_relu=apply_relu, out_dtype=out_dtype)
    out = out[: feat.shape[0], :out_dim]
    return out.reshape(*image.shape[:-1], out_dim)


# --------------------------- factory (module port) ----------------------------
class ImageFeatureEncoderFactory:
    """JAX/Pallas port of mmf's ImageFeatureEncoderFactory forward()."""

    def __init__(self, encoder_type, in_dim, out_dim=None, key=None,
                 out_dtype=jnp.float32):
        self.type = encoder_type
        self.in_dim = in_dim
        self.out_dtype = out_dtype

        if encoder_type in ("default", "identity"):
            self.params = {}
            self.out_dim = in_dim
            return

        if encoder_type not in ("projection", "finetune_faster_rcnn_fpn_fc7"):
            raise NotImplementedError("Unknown Image Encoder: %s" % encoder_type)

        # TODO(synk): the real frcnn_fc7 module loads fc7_w.pkl / fc7_b.pkl
        # (detectron weights) from disk; synthetic weights of the same
        # (out_dim, in_dim) nn.Linear layout are used in this script.
        out_dim = out_dim or in_dim
        kw, kb = jax.random.split(key)
        w_pt = 0.02 * jax.random.normal(kw, (out_dim, in_dim), jnp.float32)
        bias = 0.02 * jax.random.normal(kb, (out_dim,), jnp.float32)
        self.out_dim = out_dim
        self.params = {"w": w_pt.T, "b": bias}  # (in, out) layout: y = x @ W + b

        # One-time pad + bf16 cast of the weight (kernel reads it exactly once/call).
        Kp = _round_up(in_dim, 128)
        Np = _round_up(out_dim, 128)
        self._w_p = _pad_axis(_pad_axis(w_pt.T, Kp, 0), Np, 1).astype(jnp.bfloat16)
        self._b_p = _pad_axis(bias.astype(jnp.float32), Np, 0).reshape(1, Np)
        self._apply_relu = encoder_type == "finetune_faster_rcnn_fpn_fc7"

    def __call__(self, image):
        if self.type in ("default", "identity"):
            return image  # nn.Identity
        return _linear_encode(
            image, self._w_p, self._b_p,
            out_dim=self.out_dim,
            apply_relu=self._apply_relu,
            out_dtype=self.out_dtype,
        )


# ------------------------------------ main ------------------------------------
if __name__ == "__main__":
    key = jax.random.PRNGKey(0)
    k_img, k_enc, k_proj = jax.random.split(key, 3)

    B, NUM_BOXES, IN_DIM, OUT_DIM = 2, 64, 256, 256
    image = jax.random.normal(k_img, (B, NUM_BOXES, IN_DIM), jnp.float32)

    # --- frcnn_fc7 path: relu(linear(image)), f32 output ---------------------
    enc = ImageFeatureEncoderFactory(
        "finetune_faster_rcnn_fpn_fc7", in_dim=IN_DIM, out_dim=OUT_DIM, key=k_enc
    )
    out = jax.block_until_ready(enc(image))
    assert out.shape == (B, NUM_BOXES, OUT_DIM) and out.dtype == jnp.float32
    assert bool(jnp.all(out >= 0.0))
    ref = jax.nn.relu(image @ enc.params["w"] + enc.params["b"])
    assert float(jnp.max(jnp.abs(out - ref))) < 5e-2  # bf16-matmul tolerance

    # --- projection path: plain linear, bf16 output (configurable dtype) -----
    proj = ImageFeatureEncoderFactory(
        "projection", in_dim=IN_DIM, out_dim=OUT_DIM, key=k_proj,
        out_dtype=jnp.bfloat16,
    )
    pout = jax.block_until_ready(proj(image))
    assert pout.shape == (B, NUM_BOXES, OUT_DIM) and pout.dtype == jnp.bfloat16
    pref = image @ proj.params["w"] + proj.params["b"]
    assert float(jnp.max(jnp.abs(pout.astype(jnp.float32) - pref))) < 5e-2

    # --- identity / default path ---------------------------------------------
    ident = ImageFeatureEncoderFactory("identity", in_dim=IN_DIM)
    iout = jax.block_until_ready(ident(image))
    assert iout.shape == image.shape

    print("KERNEL_OK")
</pallas_src>

<mosaic_0001>
module attributes {stable_mosaic.version = 11 : i64} {
  func.func @_linear_act_kernel(%arg0: i32, %arg1: i32, %arg2: memref<128x256xbf16, #tpu.memory_space<vmem>>, %arg3: memref<256x128xbf16, #tpu.memory_space<vmem>>, %arg4: memref<1x128xf32, #tpu.memory_space<vmem>>, %arg5: memref<128x128xf32, #tpu.memory_space<vmem>>) attributes {dimension_semantics = [#tpu.dimension_semantics<parallel>, #tpu.dimension_semantics<parallel>], iteration_bounds = array<i64: 1, 2>, scalar_prefetch = 0 : i64, scratch_operands = 0 : i64, tpu.core_type = #tpu.core_type<tc>, window_params = [{transform_indices = @transform_0, window_bounds = array<i64: 128, 256>}, {transform_indices = @transform_1, window_bounds = array<i64: 256, 128>}, {transform_indices = @transform_2, window_bounds = array<i64: 1, 128>}, {transform_indices = @transform_3, window_bounds = array<i64: 128, 128>}]} {
    %c0 = arith.constant 0 : index
    %c0_0 = arith.constant 0 : index
    %0 = vector.load %arg2[%c0, %c0_0] : memref<128x256xbf16, #tpu.memory_space<vmem>>, vector<128x256xbf16>
    %c0_1 = arith.constant 0 : index
    %c0_2 = arith.constant 0 : index
    %1 = vector.load %arg3[%c0_1, %c0_2] : memref<256x128xbf16, #tpu.memory_space<vmem>>, vector<256x128xbf16>
    %cst = arith.constant dense<0.000000e+00> : vector<128x128xf32>
    %2 = tpu.matmul %0, %1, %cst {dimension_numbers = #tpu.dot_dimension_numbers<[1], [0], [0], [1], [0, 0, 1, 1], [], []>} : vector<128x256xbf16>, vector<256x128xbf16>, vector<128x128xf32> -> vector<128x128xf32>
    %c0_3 = arith.constant 0 : index
    %c0_4 = arith.constant 0 : index
    %3 = vector.load %arg4[%c0_3, %c0_4] : memref<1x128xf32, #tpu.memory_space<vmem>>, vector<1x128xf32>
    %4 = vector.broadcast %3 : vector<1x128xf32> to vector<128x128xf32>
    %5 = arith.addf %2, %4 : vector<128x128xf32>
    %cst_5 = arith.constant 0.000000e+00 : f32
    %6 = vector.broadcast %cst_5 : f32 to vector<128x128xf32>
    %7 = arith.maximumf %5, %6 : vector<128x128xf32>
    %c0_6 = arith.constant 0 : index
    %c0_7 = arith.constant 0 : index
    %8 = vector.load %arg5[%c0_6, %c0_7] : memref<128x128xf32, #tpu.memory_space<vmem>>, vector<128x128xf32>
    tpu.vector_store %arg5[%c0_6, %c0_7], %7 {strides = array<i32>} : memref<128x128xf32, #tpu.memory_space<vmem>>, vector<128x128xf32>,
    return
  }
  func.func @transform_0(%arg0: i32, %arg1: i32) -> (i32, i32) {
    %c0_i32 = arith.constant 0 : i32
    %c0_i32_0 = arith.constant 0 : i32
    return %arg0, %c0_i32 : i32, i32
  }
  func.func @transform_1(%arg0: i32, %arg1: i32) -> (i32, i32) {
    %c0_i32 = arith.constant 0 : i32
    %c0_i32_0 = arith.constant 0 : i32
    return %c0_i32, %arg1 : i32, i32
  }
  func.func @transform_2(%arg0: i32, %arg1: i32) -> (i32, i32) {
    %c0_i32 = arith.constant 0 : i32
    %c0_i32_0 = arith.constant 0 : i32
    return %c0_i32, %arg1 : i32, i32
  }
  func.func @transform_3(%arg0: i32, %arg1: i32) -> (i32, i32) {
    %c0_i32 = arith.constant 0 : i32
    return %arg0, %arg1 : i32, i32
  }
}

</mosaic_0001>

<bundles_post_ra>
// kernel: _linear_encode.1
= control target key start
LH: loop header
LB: loop body
LE: loop exit
PB: predicated region body
PF: predicated region fallthrough
CT: control target
= control target key end

     0   :  { %8 = vsyncpa [#allocation4], 0  ;;  %s1562_s0 = inlined_call_operand.vmem [shape: bf16[128,256], index: 0, kind: input, shape index: {}]   ;;  %s1563_s1 = inlined_call_operand.vmem [shape: bf16[256,256], index: 1, kind: input, shape index: {}]   ;;  %s1564_s2 = inlined_call_operand.vmem [shape: f32[1,256], index: 2, kind: input, shape index: {}]   ;;  %s1565_s3 = inlined_call_operand.hbm [shape: f32[128,256], index: 3, kind: output, shape index: {}]  }
   0x1   :  { %10 = vsyncpa [#allocation4 + $0x1], 0  ;;  %s1220_s12 = smov 0   ;;  %s1222_s13 = smov 0  }
   0x2   :  { %s1224_s14 = smov 0   ;;  %s1226_s15 = smov 0  }
   0x3   :  { %s1228_s16 = smov 0   ;;  %s1230_s17 = smov 0  }
   0x4 LB: > { %s868_s18 = sadd.s32 4294967295, %s1195_s17   ;;  %s869_s19 = sadd.s32 4294967294, %s1195_s17   ;;  %s1195_s17 = sphi %s1230_s17, %s16_s17   ;;  %s1191_s16 = sphi %s1228_s16, %s1572_s16   ;;  %s1187_s15 = sphi %s1226_s15, %s1571_s15   ;;  %s1183_s14 = sphi %s1224_s14, %s1570_s14   ;;  %s1179_s13 = sphi %s1222_s13, %s1569_s13   ;;  %s1175_s12 = sphi %s1220_s12, %s1568_s12  }
   0x5   : > { %s25_s20 = sadd.s32 1, %s1191_s16  ;;  %s61_s21 = sadd.s32 1, %s1183_s14 }
   0x6   : > { %p26_p0 = scmp.ge.s32.totalorder %s25_s20, 2  ;;  %p68_p1 = scmp.ne.s32.totalorder %s1183_s14, %s1179_s13 }
   0x7   : > { %p69_p2 = scmp.eq.s32.totalorder %s1195_s17, 0  ;;  %p126_p3 = scmp.eq.s32.totalorder %s868_s18, 1 }
   0x8   : > { %s1574_s20 = smov (%p26_p0, %s25_s20), 0  ;;  %p131_p6 = scmp.ne.s32.totalorder %s1179_s13, %s1175_s12 }
   0x9   : > { %p70_p4 = por %p69_p2, %p68_p1  ;;  %p1259_p5 = por %p126_p3, %p68_p1 }
   0xa   : > { %s58_s23 = ssub.s32 %s1191_s16, %s1574_s20  ;;  %p132_p8 = scmp.eq.s32.totalorder %s869_s19, 1 }
   0xb   : > { %p59_p7 = scmp.eq.s32.totalorder %s58_s23, 0  ;;  %p872_p10 = scmp.ge.s32.totalorder %s1195_s17, 2 }
   0xc   : > { %p1270_p9 = por %p132_p8, %p131_p6 }
   0xd   : > { %s1268_s24 = scalar_select %p59_p7, %s1183_s14, %s61_s21  }
   0xe   : > { %158 = sbr.rel (%p872_p10) target bundleno = 55 (0x37), region = 20 }
  0x13   : > { %161 = sbr.rel (!%p70_p4) target bundleno = 55 (0x37), region = 24  ;;  %s163_s26 = sand.u32 (%p70_p4), 1, %s1183_s14  }
  0x14   : > { %s874_s27 = sshll.u32 (%p70_p4), %s1191_s16, 2  ;;  %s873_s28 = sshll.u32 (%p70_p4), %s163_s26, 7 }
  0x15   : > { %s1282_s4 = scalar_lea.vmem (%p70_p4), %s1563_s1, %s874_s27  ;;  %s1286_s5 = scalar_lea.vmem (%p70_p4), [#allocation2], %s873_s28 }
  0x16   : > { %v184_v0 = vld [vmem:[%s1282_s4] sm:$0xf] (%p70_p4)  ;;  %v186_v1 = vld [vmem:[%s1282_s4 + $0x8] sm:$0xf] (%p70_p4)  ;;  %v188_v2 = vld [vmem:[%s1282_s4 + $0x10] sm:$0xf] (%p70_p4) }
  0x17   : > { %185 = vst [vmem:[%s1286_s5] sm:$0xf] (%p70_p4), %v184_v0  ;;  %v190_v3 = vld [vmem:[%s1282_s4 + $0x18] sm:$0xf] (%p70_p4)  ;;  %v192_v4 = vld [vmem:[%s1282_s4 + $0x20] sm:$0xf] (%p70_p4) }
  0x18   : > { %187 = vst [vmem:[%s1286_s5 + $0x4] sm:$0xf] %v186_v1  ;;  %v194_v5 = vld [vmem:[%s1282_s4 + $0x28] sm:$0xf]  ;;  %v196_v6 = vld [vmem:[%s1282_s4 + $0x30] sm:$0xf] }
  0x19   : > { %189 = vst [vmem:[%s1286_s5 + $0x8] sm:$0xf] %v188_v2  ;;  %v198_v7 = vld [vmem:[%s1282_s4 + $0x38] sm:$0xf]  ;;  %v200_v8 = vld [vmem:[%s1282_s4 + $0x40] sm:$0xf] }
  0x1a   : > { %191 = vst [vmem:[%s1286_s5 + $0xc] sm:$0xf] %v190_v3  ;;  %v202_v9 = vld [vmem:[%s1282_s4 + $0x48] sm:$0xf]  ;;  %v204_v10 = vld [vmem:[%s1282_s4 + $0x50] sm:$0xf] }
  0x1b   : > { %193 = vst [vmem:[%s1286_s5 + $0x10] sm:$0xf] %v192_v4  ;;  %v206_v11 = vld [vmem:[%s1282_s4 + $0x58] sm:$0xf]  ;;  %v208_v12 = vld [vmem:[%s1282_s4 + $0x60] sm:$0xf] }
  0x1c   : > { %195 = vst [vmem:[%s1286_s5 + $0x14] sm:$0xf] %v194_v5  ;;  %v210_v13 = vld [vmem:[%s1282_s4 + $0x68] sm:$0xf]  ;;  %v212_v14 = vld [vmem:[%s1282_s4 + $0x70] sm:$0xf] }
  0x1d   : > { %197 = vst [vmem:[%s1286_s5 + $0x18] sm:$0xf] %v196_v6  ;;  %v214_v15 = vld [vmem:[%s1282_s4 + $0x78] sm:$0xf]  ;;  %v216_v16 = vld [vmem:[%s1282_s4 + $0x80] sm:$0xf] }
  0x1e   : > { %199 = vst [vmem:[%s1286_s5 + $0x1c] sm:$0xf] %v198_v7  ;;  %v218_v17 = vld [vmem:[%s1282_s4 + $0x88] sm:$0xf]  ;;  %v220_v18 = vld [vmem:[%s1282_s4 + $0x90] sm:$0xf] }
  0x1f   : > { %201 = vst [vmem:[%s1286_s5 + $0x20] sm:$0xf] %v200_v8  ;;  %v222_v19 = vld [vmem:[%s1282_s4 + $0x98] sm:$0xf]  ;;  %v224_v20 = vld [vmem:[%s1282_s4 + $0xa0] sm:$0xf] }
  0x20   : > { %203 = vst [vmem:[%s1286_s5 + $0x24] sm:$0xf] %v202_v9  ;;  %v226_v21 = vld [vmem:[%s1282_s4 + $0xa8] sm:$0xf]  ;;  %v228_v22 = vld [vmem:[%s1282_s4 + $0xb0] sm:$0xf] }
  0x21   : > { %205 = vst [vmem:[%s1286_s5 + $0x28] sm:$0xf] %v204_v10  ;;  %v230_v23 = vld [vmem:[%s1282_s4 + $0xb8] sm:$0xf]  ;;  %v232_v24 = vld [vmem:[%s1282_s4 + $0xc0] sm:$0xf] }
  0x22   : > { %207 = vst [vmem:[%s1286_s5 + $0x2c] sm:$0xf] %v206_v11  ;;  %v234_v25 = vld [vmem:[%s1282_s4 + $0xc8] sm:$0xf]  ;;  %v236_v26 = vld [vmem:[%s1282_s4 + $0xd0] sm:$0xf] }
  0x23   : > { %209 = vst [vmem:[%s1286_s5 + $0x30] sm:$0xf] %v208_v12  ;;  %v238_v27 = vld [vmem:[%s1282_s4 + $0xd8] sm:$0xf]  ;;  %v240_v28 = vld [vmem:[%s1282_s4 + $0xe0] sm:$0xf] }
  0x24   : > { %211 = vst [vmem:[%s1286_s5 + $0x34] sm:$0xf] %v210_v13  ;;  %v242_v29 = vld [vmem:[%s1282_s4 + $0xe8] sm:$0xf]  ;;  %v244_v30 = vld [vmem:[%s1282_s4 + $0xf0] sm:$0xf] }
  0x25   : > { %213 = vst [vmem:[%s1286_s5 + $0x38] sm:$0xf] %v212_v14  ;;  %v246_v31 = vld [vmem:[%s1282_s4 + $0xf8] sm:$0xf] }
  0x26   : > { %215 = vst [vmem:[%s1286_s5 + $0x3c] sm:$0xf] %v214_v15 }
  0x27   : > { %217 = vst [vmem:[%s1286_s5 + $0x40] sm:$0xf] %v216_v16 }
  0x28   : > { %219 = vst [vmem:[%s1286_s5 + $0x44] sm:$0xf] %v218_v17 }
  0x29   : > { %221 = vst [vmem:[%s1286_s5 + $0x48] sm:$0xf] %v220_v18 }
  0x2a   : > { %223 = vst [vmem:[%s1286_s5 + $0x4c] sm:$0xf] %v222_v19 }
  0x2b   : > { %225 = vst [vmem:[%s1286_s5 + $0x50] sm:$0xf] %v224_v20 }
  0x2c   : > { %227 = vst [vmem:[%s1286_s5 + $0x54] sm:$0xf] %v226_v21 }
  0x2d   : > { %229 = vst [vmem:[%s1286_s5 + $0x58] sm:$0xf] %v228_v22 }
  0x2e   : > { %231 = vst [vmem:[%s1286_s5 + $0x5c] sm:$0xf] %v230_v23 }
  0x2f   : > { %233 = vst [vmem:[%s1286_s5 + $0x60] sm:$0xf] %v232_v24 }
  0x30   : > { %235 = vst [vmem:[%s1286_s5 + $0x64] sm:$0xf] %v234_v25 }
  0x31   : > { %237 = vst [vmem:[%s1286_s5 + $0x68] sm:$0xf] %v236_v26 }
  0x32   : > { %239 = vst [vmem:[%s1286_s5 + $0x6c] sm:$0xf] %v238_v27 }
  0x33   : > { %241 = vst [vmem:[%s1286_s5 + $0x70] sm:$0xf] %v240_v28 }
  0x34   : > { %243 = vst [vmem:[%s1286_s5 + $0x74] sm:$0xf] %v242_v29 }
  0x35   : > { %245 = vst [vmem:[%s1286_s5 + $0x78] sm:$0xf] %v244_v30 }
  0x36   : > { %247 = vst [vmem:[%s1286_s5 + $0x7c] sm:$0xf] %v246_v31 }
  0x37 PF: > { %p875_p11 = scmp.ge.s32.totalorder %s1195_s17, 1  ;;  %p340_p12 = scmp.lt.s32.totalorder %s1195_s17, 3 }
  0x39   : > { %p341_p13 = pnand %p875_p11, %p340_p12 }
  0x3a   : > { %s347_s6 = sand.u32 (!%p341_p13), 1, %s1179_s13   ;;  %p386_p0 = scmp.lt.s32.totalorder (!%p341_p13), %s1187_s15, 1 }
  0x3b   : > { %344 = sbr.rel (%p341_p13) target bundleno = 295 (0x127), region = 69  ;;  %s1355_s7 = sshll.u32 (!%p341_p13), %s347_s6, 7 }
  0x3c   : > { %s1359_s8 = scalar_lea.vmem (!%p341_p13), [#allocation2], %s1355_s7  ;;  %s1489_s21 = scalar_lea.vmem (!%p341_p13), [#allocation3], %s1355_s7 }
  0x3d   : > { %s1007_s7 = sshll.u32 (!%p341_p13), %s1187_s15, 3  ;;  %s763_s26 = sshll.u32 (!%p341_p13), %s1489_s21, 4  ;;  %s764_s26 = int_to_ptr.vmem [resolvable:$true] %s763_s26 }
  0x3e   : > { %s762_s23 = scalar_lea.hbm (!%p341_p13), %s1565_s3, %s1007_s7  ;;  %s1137_s5 = scalar_lea.hbm (!%p341_p13), %s1565_s3, 256 }
  0x3f   : > { %s765_s27 = sshll.u32 (!%p341_p13), %s762_s23, 4  ;;  %s766_s27 = int_to_ptr.hbm [resolvable:$true] %s765_s27 }
  0x40   : > { %v1033_v32 = vld [vmem:[%s1359_s8 + $0x38] sm:$0xff]  ;;  %v1032_v34 = vld [vmem:[%s1359_s8 + $0x30] sm:$0xff]  ;;  %s1366_s9 = scalar_select %p386_p0, %s1187_s15, 1  ;;  %v1031_v36 = vld [vmem:[%s1359_s8 + $0x28] sm:$0xff] }
  0x41   : > { %v1041_v33 = vld [vmem:[%s1359_s8 + $0x78] sm:$0xff]  ;;  %618 = vmatpush.bf16.msra.mxu0 %v1033_v32  ;;  %1042 = vmatpush.bf16.msra.mxu2 %v1033_v32  ;;  %v1040_v35 = vld [vmem:[%s1359_s8 + $0x70] sm:$0xff]  ;;  %v1039_v37 = vld [vmem:[%s1359_s8 + $0x68] sm:$0xff]  ;;  %s749_s15 = scalar_lea.sflag [#allocation4], %s347_s6  ;;  %s1131_s28 = sshra.s32 %s766_s27, 4  ;;  %s1132_s28 = int_to_ptr.hbm [resolvable:$true] %s1131_s28 }
  0x42   : > { %667 = vmatpush.bf16.msra.mxu1 %v1041_v33  ;;  %1050 = vmatpush.bf16.msra.mxu3 %v1041_v33  ;;  %s388_s18 = scalar_lea.vmem %s1564_s2, %s1366_s9  ;;  %v1030_v38 = vld [vmem:[%s1359_s8 + $0x20] sm:$0xff]  ;;  %v1029_v40 = vld [vmem:[%s1359_s8 + $0x18] sm:$0xff]  ;;  %v1028_v42 = vld [vmem:[%s1359_s8 + $0x10] sm:$0xff]  ;;  %s1133_s29 = scalar_lea.hbm %s1132_s28, 128 }
  0x43   : > { %v1038_v39 = vld [vmem:[%s1359_s8 + $0x60] sm:$0xff]  ;;  %v1037_v41 = vld [vmem:[%s1359_s8 + $0x58] sm:$0xff]  ;;  %v1036_v43 = vld [vmem:[%s1359_s8 + $0x50] sm:$0xff]  ;;  %p1134_p1 = scmp.ne.s32.totalorder %s1132_s28, %s1133_s29  ;;  %p1138_p4 = scmp.lt.s32.totalorder %s1132_s28, %s1565_s3 }
  0x44   : > { %v1027_v44 = vld [vmem:[%s1359_s8 + $0x8] sm:$0xff]  ;;  %v880_v46 = vld [vmem:[%s1562_s0] sm:$0xf]  ;;  %v1010_v52 = vld [vmem:[%s1562_s0 + $0x4] sm:$0xf]  ;;  %p1139_p6 = scmp.lt.s32.totalorder %s1137_s5, %s1133_s29 }
  0x45   : > { %619 = vmatpush.bf16.msra.mxu0 %v1032_v34  ;;  %1043 = vmatpush.bf16.msra.mxu2 %v1032_v34  ;;  %v1035_v45 = vld [vmem:[%s1359_s8 + $0x48] sm:$0xff]  ;;  %v1026_v47 = vld [vmem:[%s1359_s8] sm:$0xff]  ;;  %v888_v60 = vld [vmem:[%s1562_s0 + $0x10] sm:$0xf]  ;;  %p1135_p2 = pnand %p1134_p1, %p1259_p5 }
  0x46   : > { %668 = vmatpush.bf16.msra.mxu1 %v1040_v35  ;;  %1051 = vmatpush.bf16.msra.mxu3 %v1040_v35  ;;  %v1034_v48 = vld [vmem:[%s1359_s8 + $0x40] sm:$0xff]  ;;  %v1011_v49 = vld [vmem:[%s1562_s0 + $0x4] sm:$0xf0]  ;;  %v882_v53 = vld [vmem:[%s1562_s0 + $0x8] sm:$0xf0]  ;;  %p1140_p7 = por %p1139_p6, %p1138_p4 }
  0x47   : > { %v912_v50 = vld [vmem:[%s1562_s0 + $0x40] sm:$0xf]  ;;  %v1019_v51 = vld [vmem:[%s1562_s0 + $0x44] sm:$0xf0]  ;;  %v1018_v54 = vld [vmem:[%s1562_s0 + $0x44] sm:$0xf]  ;;  %v881_v56 = vor.u32 %v1011_v49, %v880_v46  ;;  %v885_v58 = vor.u32 %v1010_v52, %v882_v53  ;;  %p1136_p3 = pneg %p1135_p2 }
  0x48   : > { %v914_v55 = vld [vmem:[%s1562_s0 + $0x48] sm:$0xf0]  ;;  %v913_v57 = vor.u32 %v1019_v51, %v912_v50  ;;  %v1013_v61 = vld [vmem:[%s1562_s0 + $0x14] sm:$0xf0]  ;;  %v920_v62 = vld [vmem:[%s1562_s0 + $0x50] sm:$0xf] }
  0x49   : > { %620 = vmatpush.bf16.msra.mxu0 %v1031_v36  ;;  %1044 = vmatpush.bf16.msra.mxu2 %v1031_v36  ;;  %v917_v59 = vor.u32 %v1018_v54, %v914_v55  ;;  %v1021_v63 = vld [vmem:[%s1562_s0 + $0x54] sm:$0xf0]  ;;  %v1012_v0 = vld [vmem:[%s1562_s0 + $0x14] sm:$0xf]  ;;  %v890_v1 = vld [vmem:[%s1562_s0 + $0x18] sm:$0xf0]  ;;  %v889_v4 = vor.u32 %v1013_v61, %v888_v60  ;;  %p1141_p8 = pnand %p1140_p7, %p1136_p3 }
  0x4a   : > { %669 = vmatpush.bf16.msra.mxu1 %v1039_v37  ;;  %1052 = vmatpush.bf16.msra.mxu3 %v1039_v37  ;;  %v1020_v2 = vld [vmem:[%s1562_s0 + $0x54] sm:$0xf]  ;;  %v922_v3 = vld [vmem:[%s1562_s0 + $0x58] sm:$0xf0]  ;;  %v921_v5 = vor.u32 %v1021_v63, %v920_v62  ;;  %v893_v6 = vor.u32 %v1012_v0, %v890_v1  ;;  %v896_v8 = vld [vmem:[%s1562_s0 + $0x20] sm:$0xf] }
  0x4b   : > { %v925_v7 = vor.u32 %v1020_v2, %v922_v3  ;;  %v1015_v9 = vld [vmem:[%s1562_s0 + $0x24] sm:$0xf0]  ;;  %v928_v10 = vld [vmem:[%s1562_s0 + $0x60] sm:$0xf]  ;;  %v1014_v12 = vld [vmem:[%s1562_s0 + $0x24] sm:$0xf] }
  0x4c   : > { %v1023_v11 = vld [vmem:[%s1562_s0 + $0x64] sm:$0xf0]  ;;  %v898_v13 = vld [vmem:[%s1562_s0 + $0x28] sm:$0xf0]  ;;  %v1022_v14 = vld [vmem:[%s1562_s0 + $0x64] sm:$0xf]  ;;  %v897_v16 = vor.u32 %v1015_v9, %v896_v8 }
  0x4d   : > { %621 = vmatpush.bf16.msra.mxu0 %v1030_v38  ;;  %1045 = vmatpush.bf16.msra.mxu2 %v1030_v38  ;;  %v930_v15 = vld [vmem:[%s1562_s0 + $0x68] sm:$0xf0]  ;;  %v929_v17 = vor.u32 %v1023_v11, %v928_v10  ;;  %v901_v18 = vor.u32 %v1014_v12, %v898_v13  ;;  %v904_v20 = vld [vmem:[%s1562_s0 + $0x30] sm:$0xf]  ;;  %v1017_v21 = vld [vmem:[%s1562_s0 + $0x34] sm:$0xf0] }
  0x4e   : > { %670 = vmatpush.bf16.msra.mxu1 %v1038_v39  ;;  %1053 = vmatpush.bf16.msra.mxu3 %v1038_v39  ;;  %v933_v19 = vor.u32 %v1022_v14, %v930_v15  ;;  %v936_v22 = vld [vmem:[%s1562_s0 + $0x70] sm:$0xf]  ;;  %v1025_v23 = vld [vmem:[%s1562_s0 + $0x74] sm:$0xf0]  ;;  %v1016_v24 = vld [vmem:[%s1562_s0 + $0x34] sm:$0xf]  ;;  %v905_v28 = vor.u32 %v1017_v21, %v904_v20 }
  0x4f   : > { %v906_v25 = vld [vmem:[%s1562_s0 + $0x38] sm:$0xf0]  ;;  %v1024_v26 = vld [vmem:[%s1562_s0 + $0x74] sm:$0xf]  ;;  %v937_v29 = vor.u32 %v1025_v23, %v936_v22  ;;  %v1485_v32 = vld [vmem:[%s388_s18] ss:$0 sm:$0xff] }
  0x50   : > { %v938_v27 = vld [vmem:[%s1562_s0 + $0x78] sm:$0xf0]  ;;  %v909_v30 = vor.u32 %v1016_v24, %v906_v25 }
  0x51   : > { %622 = vmatpush.bf16.msra.mxu0 %v1029_v40  ;;  %1046 = vmatpush.bf16.msra.mxu2 %v1029_v40  ;;  %v941_v31 = vor.u32 %v1024_v26, %v938_v27 }
  0x52   : > { %671 = vmatpush.bf16.msra.mxu1 %v1037_v41  ;;  %1054 = vmatpush.bf16.msra.mxu3 %v1037_v41 }
  0x55   : > { %623 = vmatpush.bf16.msra.mxu0 %v1028_v42  ;;  %1047 = vmatpush.bf16.msra.mxu2 %v1028_v42 }
  0x56   : > { %672 = vmatpush.bf16.msra.mxu1 %v1036_v43  ;;  %1055 = vmatpush.bf16.msra.mxu3 %v1036_v43 }
  0x59   : > { %624 = vmatpush.bf16.msra.mxu0 %v1027_v44  ;;  %1048 = vmatpush.bf16.msra.mxu2 %v1027_v44 }
  0x5a   : > { %673 = vmatpush.bf16.msra.mxu1 %v1035_v45  ;;  %1056 = vmatpush.bf16.msra.mxu3 %v1035_v45 }
  0x5d   : > { %625 = vmatpush.bf16.msra.mxu0 %v1026_v47  ;;  %1049 = vmatpush.bf16.msra.mxu2 %v1026_v47 }
  0x5e   : > { %674 = vmatpush.bf16.msra.mxu1 %v1034_v48  ;;  %1057 = vmatpush.bf16.msra.mxu3 %v1034_v48 }
  0x60   : > { %626 = vmatmul.bf16.vlgmr.msra.gmra.mxu0 %v881_v56  ;;  %646 = vmatmul.bf16.vlgmr.msra.gmra.mxu2 %v913_v57 }
  0x61   : > { %675 = vmatmul.bf16.vlgmr.msra.gmra.mxu1 %v885_v58  ;;  %695 = vmatmul.bf16.vlgmr.msra.gmra.mxu3 %v917_v59 }
  0x70   : > { %631 = vmatmul.bf16.gmra.mxu0 %v889_v4  ;;  %651 = vmatmul.bf16.gmra.mxu2 %v921_v5 }
  0x71   : > { %680 = vmatmul.bf16.gmra.mxu1 %v893_v6  ;;  %700 = vmatmul.bf16.gmra.mxu3 %v925_v7 }
  0x80   : > { %636 = vmatmul.bf16.gmra.mxu0 %v897_v16  ;;  %656 = vmatmul.bf16.gmra.mxu2 %v929_v17 }
  0x81   : > { %685 = vmatmul.bf16.gmra.mxu1 %v901_v18  ;;  %705 = vmatmul.bf16.gmra.mxu3 %v933_v19 }
  0x90   : > { %641 = vmatmul.bf16.gmra.mxu0 %v905_v28  ;;  %661 = vmatmul.bf16.gmra.mxu2 %v937_v29 }
  0x91   : > { %690 = vmatmul.bf16.gmra.mxu1 %v909_v30  ;;  %710 = vmatmul.bf16.gmra.mxu3 %v941_v31 }
  0xdd   : > { %v627_v33 = vpop.f32.mrf.mxu0 }
  0xde   : > { %v628_v34 = vadd.f32 %v1485_v32, %v627_v33  ;;  %v676_v35 = vpop.f32.mrf.mxu1 }
  0xe0   : > { %v677_v36 = vadd.f32 %v676_v35, %v628_v34 }
  0xe2   : > { %v716_v37 = vmax.f32 %v677_v36, 0.0 }
  0xe3   : > { %v647_v38 = vpop.f32.mrf.mxu2 }
  0xe4   : > { %732 = vst [vmem:[%s1489_s21] sm:$0xff] %v716_v37  ;;  %v648_v39 = vadd.f32 %v1485_v32, %v647_v38  ;;  %v696_v40 = vpop.f32.mrf.mxu3 }
  0xe5   : > { %v629_v41 = vpop.f32.mrf.mxu0 }
  0xe6   : > { %v697_v42 = vadd.f32 %v696_v40, %v648_v39  ;;  %v630_v43 = vadd.f32 %v1485_v32, %v629_v41  ;;  %v678_v44 = vpop.f32.mrf.mxu1 }
  0xe8   : > { %v724_v45 = vmax.f32 %v697_v42, 0.0  ;;  %v679_v46 = vadd.f32 %v678_v44, %v630_v43 }
  0xea   : > { %740 = vst [vmem:[%s1489_s21 + $0x40] sm:$0xff] %v724_v45  ;;  %v717_v47 = vmax.f32 %v679_v46, 0.0 }
  0xeb   : > { %v649_v48 = vpop.f32.mrf.mxu2 }
  0xec   : > { %733 = vst [vmem:[%s1489_s21 + $0x8] sm:$0xff] %v717_v47  ;;  %v650_v49 = vadd.f32 %v1485_v32, %v649_v48  ;;  %v698_v50 = vpop.f32.mrf.mxu3 }
  0xed   : > { %v632_v51 = vpop.f32.mrf.mxu0 }
  0xee   : > { %v699_v52 = vadd.f32 %v698_v50, %v650_v49  ;;  %v633_v53 = vadd.f32 %v1485_v32, %v632_v51  ;;  %v681_v54 = vpop.f32.mrf.mxu1 }
  0xf0   : > { %v725_v55 = vmax.f32 %v699_v52, 0.0  ;;  %v682_v56 = vadd.f32 %v681_v54, %v633_v53 }
  0xf2   : > { %741 = vst [vmem:[%s1489_s21 + $0x48] sm:$0xff] %v725_v55  ;;  %v718_v57 = vmax.f32 %v682_v56, 0.0 }
  0xf3   : > { %v652_v58 = vpop.f32.mrf.mxu2 }
  0xf4   : > { %734 = vst [vmem:[%s1489_s21 + $0x10] sm:$0xff] %v718_v57  ;;  %v653_v59 = vadd.f32 %v1485_v32, %v652_v58  ;;  %v701_v60 = vpop.f32.mrf.mxu3 }
  0xf5   : > { %v634_v61 = vpop.f32.mrf.mxu0 }
  0xf6   : > { %v702_v62 = vadd.f32 %v701_v60, %v653_v59  ;;  %v635_v63 = vadd.f32 %v1485_v32, %v634_v61  ;;  %v683_v0 = vpop.f32.mrf.mxu1 }
  0xf8   : > { %v726_v1 = vmax.f32 %v702_v62, 0.0  ;;  %v684_v2 = vadd.f32 %v683_v0, %v635_v63 }
  0xfa   : > { %742 = vst [vmem:[%s1489_s21 + $0x50] sm:$0xff] %v726_v1  ;;  %v719_v3 = vmax.f32 %v684_v2, 0.0 }
  0xfb   : > { %v654_v4 = vpop.f32.mrf.mxu2 }
  0xfc   : > { %735 = vst [vmem:[%s1489_s21 + $0x18] sm:$0xff] %v719_v3  ;;  %v655_v5 = vadd.f32 %v1485_v32, %v654_v4  ;;  %v703_v6 = vpop.f32.mrf.mxu3 }
  0xfd   : > { %v637_v7 = vpop.f32.mrf.mxu0 }
  0xfe   : > { %v704_v8 = vadd.f32 %v703_v6, %v655_v5  ;;  %v638_v9 = vadd.f32 %v1485_v32, %v637_v7  ;;  %v686_v10 = vpop.f32.mrf.mxu1 }
 0x100   : > { %v727_v11 = vmax.f32 %v704_v8, 0.0  ;;  %v687_v12 = vadd.f32 %v686_v10, %v638_v9 }
 0x102   : > { %743 = vst [vmem:[%s1489_s21 + $0x58] sm:$0xff] %v727_v11  ;;  %v720_v13 = vmax.f32 %v687_v12, 0.0 }
 0x103   : > { %v657_v14 = vpop.f32.mrf.mxu2 }
 0x104   : > { %736 = vst [vmem:[%s1489_s21 + $0x20] sm:$0xff] %v720_v13  ;;  %v658_v15 = vadd.f32 %v1485_v32, %v657_v14  ;;  %v706_v16 = vpop.f32.mrf.mxu3 }
 0x105   : > { %v639_v17 = vpop.f32.mrf.mxu0 }
 0x106   : > { %v707_v18 = vadd.f32 %v706_v16, %v658_v15  ;;  %v640_v19 = vadd.f32 %v1485_v32, %v639_v17  ;;  %v688_v20 = vpop.f32.mrf.mxu1 }
 0x108   : > { %v728_v21 = vmax.f32 %v707_v18, 0.0  ;;  %v689_v22 = vadd.f32 %v688_v20, %v640_v19 }
 0x10a   : > { %744 = vst [vmem:[%s1489_s21 + $0x60] sm:$0xff] %v728_v21  ;;  %v721_v23 = vmax.f32 %v689_v22, 0.0 }
 0x10b   : > { %v659_v24 = vpop.f32.mrf.mxu2 }
 0x10c   : > { %737 = vst [vmem:[%s1489_s21 + $0x28] sm:$0xff] %v721_v23  ;;  %v660_v25 = vadd.f32 %v1485_v32, %v659_v24  ;;  %v708_v26 = vpop.f32.mrf.mxu3 }
 0x10d   : > { %v642_v27 = vpop.f32.mrf.mxu0 }
 0x10e   : > { %v709_v28 = vadd.f32 %v708_v26, %v660_v25  ;;  %v643_v29 = vadd.f32 %v1485_v32, %v642_v27  ;;  %v691_v30 = vpop.f32.mrf.mxu1 }
 0x110   : > { %v729_v31 = vmax.f32 %v709_v28, 0.0  ;;  %v692_v33 = vadd.f32 %v691_v30, %v643_v29 }
 0x112   : > { %745 = vst [vmem:[%s1489_s21 + $0x68] sm:$0xff] %v729_v31  ;;  %v722_v34 = vmax.f32 %v692_v33, 0.0 }
 0x113   : > { %v662_v35 = vpop.f32.mrf.mxu2 }
 0x114   : > { %738 = vst [vmem:[%s1489_s21 + $0x30] sm:$0xff] %v722_v34  ;;  %v663_v36 = vadd.f32 %v1485_v32, %v662_v35  ;;  %v711_v37 = vpop.f32.mrf.mxu3 }
 0x115   : > { %v644_v38 = vpop.f32.mrf.mxu0 }
 0x116   : > { %v712_v39 = vadd.f32 %v711_v37, %v663_v36  ;;  %v645_v40 = vadd.f32 %v1485_v32, %v644_v38  ;;  %v693_v41 = vpop.f32.mrf.mxu1 }
 0x118   : > { %v730_v42 = vmax.f32 %v712_v39, 0.0  ;;  %v694_v43 = vadd.f32 %v693_v41, %v645_v40 }
 0x11a   : > { %746 = vst [vmem:[%s1489_s21 + $0x70] sm:$0xff] %v730_v42  ;;  %v723_v44 = vmax.f32 %v694_v43, 0.0 }
 0x11b   : > { %v664_v45 = vpop.f32.mrf.mxu2 }
 0x11c   : > { %739 = vst [vmem:[%s1489_s21 + $0x38] sm:$0xff] %v723_v44  ;;  %v665_v46 = vadd.f32 %v1485_v32, %v664_v45  ;;  %v713_v47 = vpop.f32.mrf.mxu3 }
 0x11e   : > { %v714_v48 = vadd.f32 %v713_v47, %v665_v46 }
 0x120   : > { %v731_v49 = vmax.f32 %v714_v48, 0.0 }
 0x122   : > { %747 = vst [vmem:[%s1489_s21 + $0x78] sm:$0xff] %v731_v49 }
 0x123   : > { %1144 = shalt.err (!%p1141_p8)
}
 0x124   : > { %s1197_s6 = smov 128   ;;  %s1198_s11 = smov 256  }
 0x125   : > { %s1199_s19 = smov 8  }
 0x126   : > { %1058 = dma.vmem_to_hbm [thread:$0]  (%p1259_p5), %s764_s26, 2048, %s766_s27, %s749_s15, %s1197_s6, %s1198_s11, %s1199_s19  }
 0x127 PF: > { %s780_s21 = sand.u32 1, %s1175_s12   ;;  %p1061_p11 = pnand %p872_p10, %p1270_p9 }
 0x128   : > { %s781_s7 = scalar_lea.sflag [#allocation4], %s780_s21 }
 0x129   : > { %p1062_p12 = pneg %p1061_p11 }
 0x12b   : > { %1170 = dma.done.wait (%p1062_p12), %s781_s7, 2048  }
 0x12c   : > { %1172 = vsyncadd (%p1062_p12), %s781_s7, 4294965248  ;;  %s16_s17 = sadd.s32 1, %s1195_s17   ;;  %s1568_s12 = smov %s1179_s13 }
 0x12d   : > { %p13_p13 = scmp.ge.s32.totalorder %s16_s17, 4   ;;  %s1569_s13 = smov %s1183_s14 }
 0x12e   : > { %s1570_s14 = smov %s1268_s24  ;;  %s1571_s15 = smov %s1191_s16 }
 0x12f   : > { %s1572_s16 = smov %s1574_s20  ;;  %15 = sbr.rel (!%p13_p13) target bundleno = 4 (0x4), region = 119 }
 0x134   :  { %787 = vsyncpa [#allocation4], 1 }
 0x135   :  { %789 = vsyncpa [#allocation4 + $0x1], 1 }

</bundles_post_ra>
